<compile_context>
chip_gen: v5e
topology: v5e:2x2
jax: 0.10.0
libtpu: 0.0.40
codegen_flags: <defaults>
</compile_context>

<pallas_src>
import jax
import jax.numpy as jnp
import numpy as np
from jax.experimental import pallas as pl
from jax.experimental.pallas import tpu as pltpu

_HALO_LANES = 128  # one lane chunk of halo; supports kernel_size - 1 <= 128


def _round_up(a, b):
    return (a + b - 1) // b * b


def _default_budgets():
    """(max_tile_bytes, vmem_limit_bytes) derived from the local chip's VMEM."""
    try:
        cap = int(pltpu.get_tpu_info().vmem_capacity_bytes)
    except Exception:  # interpret mode / older jax: fall back to v7x-safe numbers
        cap = 64 * 1024 * 1024
    vmem_limit = min(cap // 2, 96 * 1024 * 1024)  # 64 MiB on v5e/v6e, 32 MiB on v7x
    max_tile = max(512 * 1024, vmem_limit // 16)  # ~4 MiB on v5e/v6e, ~2 MiB on v7x
    return max_tile, vmem_limit


def _make_halo_kernel(taps, tl):
    """Kernel for the L-tiled path.

    x_ref: (tn, tl)   input lanes [j*tl, j*tl + tl)
    h_ref: (tn, 128)  input lanes [(j+1)*tl, (j+1)*tl + 128)   (halo)
    o_ref: (tn, tl)   output lanes [j*tl, j*tl + tl)
    """
    width = tl + _HALO_LANES
    nz_taps = [(k, float(t)) for k, t in enumerate(taps) if float(t) != 0.0]

    def kernel(x_ref, h_ref, o_ref):
        # Single VMEM load of tile + halo; tap shifts via XLU rolls on a
        # lane-aligned window (width is a multiple of 128).
        xcat = jnp.concatenate([x_ref[...], h_ref[...]], axis=1)  # (tn, width)
        acc = None
        for k, t in nz_taps:
            shifted = xcat if k == 0 else pltpu.roll(xcat, shift=width - k, axis=1)
            term = jnp.float32(t) * shifted
            acc = term if acc is None else acc + term
        if acc is None:                       # degenerate all-zero filter
            acc = jnp.zeros_like(xcat)
        # Output lane j needs inputs j..j+K-1, all inside xcat for j < tl
        # (since K-1 <= 128), so wrapped/halo-clamped lanes never reach the
        # written region; the first-tl slice is lane-aligned (free).
        o_ref[...] = acc[:, :tl].astype(o_ref.dtype)

    return kernel


def _make_small_kernel(taps, l_out):
    """Kernel for the tiny-L path (L < 128): the whole row fits in one vreg
    column, so plain offset loads are simplest and essentially free."""
    nz_taps = [(k, float(t)) for k, t in enumerate(taps) if float(t) != 0.0]

    def kernel(x_ref, o_ref):
        acc = None
        for k, t in nz_taps:
            term = jnp.float32(t) * x_ref[:, k:k + l_out]
            acc = term if acc is None else acc + term
        if acc is None:
            acc = jnp.zeros(o_ref.shape, jnp.float32)
        o_ref[...] = acc.astype(o_ref.dtype)

    return kernel


def conv1d_derivative(x, der_filter, resol, *,
                      tile_rows=None, tile_lanes=None,
                      max_tile_bytes=None, vmem_limit_bytes=None):
    """Pallas equivalent of Conv1dDerivative.forward.

    x:          (N, 1, L) array (PyTorch NCL layout)
    der_filter: (1, 1, K) fixed filter weights (non-trainable)
    resol:      python float / scalar
    returns:    (N, 1, L - K + 1) float32
    """
    x = jnp.asarray(x)
    if x.dtype != jnp.float32:
        x = x.astype(jnp.float32)
    n, c, l = x.shape
    if c != 1:
        raise ValueError("Conv1dDerivative uses a single input channel")

    taps64 = np.asarray(der_filter, dtype=np.float64).reshape(-1)
    ksize = int(taps64.shape[0])
    l_out = l - ksize + 1
    if l_out < 1:
        raise ValueError("input length must be >= kernel_size")
    if ksize - 1 > _HALO_LANES:
        raise ValueError("kernel_size - 1 must be <= 128")

    # Fixed, non-trainable filter -> bake taps (with 1/resol folded in) as
    # trace-time constants; zero taps are skipped inside the kernel.
    taps = tuple(float(t) for t in (taps64 / float(resol)).astype(np.float32))

    default_tile, default_vmem = _default_budgets()
    if max_tile_bytes is None:
        max_tile_bytes = int(default_tile)
    if vmem_limit_bytes is None:
        vmem_limit_bytes = int(default_vmem)

    # (N, 1, L) -> (N, L): squeezing the unit channel dim is metadata-only
    # (no pad/slice remains in the wrapper, so no extra HBM passes).
    x2d = x.reshape(n, l)

    def pick_rows(lane_width):
        if tile_rows is not None:
            return int(tile_rows)
        rows = max(8, (max_tile_bytes // (lane_width * 4)) // 8 * 8)
        rows = min(rows, _round_up(n, 8))
        if rows > n:            # tiny batch: use the exact row count (full dim)
            rows = n
        return int(rows)

    def make_compiler_params(ndims):
        # All grid axes are independent (the halo removes cross-block carries).
        # TODO(synk): try pltpu.CORE_PARALLEL on the row axis on v7x (2 TCs/chip).
        return pltpu.CompilerParams(
            dimension_semantics=("parallel",) * ndims,
            vmem_limit_bytes=int(vmem_limit_bytes),
        )

    if l >= 128:
        # ------------- L-tiled path with a 128-lane halo -------------
        if tile_lanes is not None:
            tl = int(tile_lanes)
        else:
            lane_cap = max(128, (max_tile_bytes // (8 * 4)) // 128 * 128)
            tl = min(_round_up(l_out, 128), lane_cap)
            if tl > l:                    # keep the main block inside the array
                tl = (l // 128) * 128
        assert tl % 128 == 0 and 128 <= tl <= l

        tn = pick_rows(tl)
        nblocks = pl.cdiv(n, tn)
        lblocks = pl.cdiv(l_out, tl)

        th = tl // 128                    # halo block-index stride (128-lane units)
        hb_last = pl.cdiv(l, 128) - 1     # last in-bounds 128-lane block of x

        out2d = pl.pallas_call(
            _make_halo_kernel(taps, tl),
            out_shape=jax.ShapeDtypeStruct((n, l_out), x.dtype),
            grid=(nblocks, lblocks),
            in_specs=[
                pl.BlockSpec((tn, tl), lambda i, j: (i, j)),
                # Halo: first 128 lanes of the *next* lane tile (clamped at the
                # array end; clamped data only feeds output lanes that Pallas
                # drops as out-of-bounds).
                pl.BlockSpec((tn, _HALO_LANES),
                             lambda i, j: (i, jnp.minimum((j + 1) * th, hb_last))),
            ],
            out_specs=pl.BlockSpec((tn, tl), lambda i, j: (i, j)),
            compiler_params=make_compiler_params(2),
        )(x2d, x2d)
    else:
        # ------------- tiny-L path: one lane block covers the row -------------
        tn = pick_rows(l)
        nblocks = pl.cdiv(n, tn)
        out2d = pl.pallas_call(
            _make_small_kernel(taps, l_out),
            out_shape=jax.ShapeDtypeStruct((n, l_out), x.dtype),
            grid=(nblocks,),
            in_specs=[pl.BlockSpec((tn, l), lambda i: (i, 0))],
            out_specs=pl.BlockSpec((tn, l_out), lambda i: (i, 0)),
            compiler_params=make_compiler_params(1),
        )(x2d)

    # (N, L_out) -> (N, 1, L_out): metadata-only reshape back to NCL.
    return out2d.reshape(n, 1, l_out)


def _reference(x, der_filter, resol):
    """Pure-JAX reference: valid conv, no padding, no bias, divided by resol."""
    w = jnp.asarray(der_filter, jnp.float32).reshape(-1)
    k = int(w.shape[0])
    l_out = x.shape[-1] - k + 1
    return sum(w[i] * x[:, :, i:i + l_out] for i in range(k)) / jnp.float32(resol)


if __name__ == "__main__":
    # Deterministic setup mirroring
    # Conv1dDerivative(DerFilter=[[[-1, 0, 1]]], resol=2*dx, kernel_size=3).
    kernel_size = 3
    dx = 0.05
    resol = 2.0 * dx
    der_filter = np.array([[[-1.0, 0.0, 1.0]]], dtype=np.float32)  # (1, 1, 3)

    key = jax.random.PRNGKey(0)
    k1, k2, k3 = jax.random.split(key, 3)

    # Case 1: canonical small shape, single grid step.
    x1 = jax.random.normal(k1, (2, 1, 128), dtype=jnp.float32)
    out1 = jax.block_until_ready(conv1d_derivative(x1, der_filter, resol))
    ref1 = _reference(x1, der_filter, resol)
    assert out1.shape == (2, 1, 126)
    np.testing.assert_allclose(np.asarray(out1), np.asarray(ref1),
                               rtol=1e-5, atol=1e-5)

    # Case 2: multi-block grid in both rows and lanes (ragged edges + halo),
    # forced by a tiny tile budget.
    x2 = jax.random.normal(k2, (20, 1, 300), dtype=jnp.float32)
    out2 = jax.block_until_ready(
        conv1d_derivative(x2, der_filter, resol, max_tile_bytes=8 * 128 * 4))
    ref2 = _reference(x2, der_filter, resol)
    assert out2.shape == (20, 1, 298)
    np.testing.assert_allclose(np.asarray(out2), np.asarray(ref2),
                               rtol=1e-5, atol=1e-5)

    # Case 3: tiny-L path (whole row in one lane chunk, non-aligned length).
    x3 = jax.random.normal(k3, (3, 1, 64), dtype=jnp.float32)
    out3 = jax.block_until_ready(conv1d_derivative(x3, der_filter, resol))
    ref3 = _reference(x3, der_filter, resol)
    assert out3.shape == (3, 1, 62)
    np.testing.assert_allclose(np.asarray(out3), np.asarray(ref3),
                               rtol=1e-5, atol=1e-5)

    print("KERNEL_OK")
</pallas_src>

<mosaic_0001>
module attributes {stable_mosaic.version = 11 : i64} {
  func.func @kernel(%arg0: i32, %arg1: i32, %arg2: memref<2x128xf32, #tpu.memory_space<vmem>>, %arg3: memref<2x128xf32, #tpu.memory_space<vmem>>, %arg4: memref<2x128xf32, #tpu.memory_space<vmem>>) attributes {dimension_semantics = [#tpu.dimension_semantics<parallel>, #tpu.dimension_semantics<parallel>], iteration_bounds = array<i64: 1, 1>, scalar_prefetch = 0 : i64, scratch_operands = 0 : i64, tpu.core_type = #tpu.core_type<tc>, window_params = [{transform_indices = @transform_0, window_bounds = array<i64: 2, 128>}, {transform_indices = @transform_1, window_bounds = array<i64: 2, 128>}, {transform_indices = @transform_2, window_bounds = array<i64: 2, 128>}]} {
    %c0 = arith.constant 0 : index
    %c0_0 = arith.constant 0 : index
    %0 = vector.load %arg2[%c0, %c0_0] : memref<2x128xf32, #tpu.memory_space<vmem>>, vector<2x128xf32>
    %c0_1 = arith.constant 0 : index
    %c0_2 = arith.constant 0 : index
    %1 = vector.load %arg3[%c0_1, %c0_2] : memref<2x128xf32, #tpu.memory_space<vmem>>, vector<2x128xf32>
    %2 = tpu.concatenate %0, %1 in 1 : vector<2x128xf32>, vector<2x128xf32> -> vector<2x256xf32>
    %cst = arith.constant -1.000000e+01 : f32
    %3 = vector.broadcast %cst : f32 to vector<2x256xf32>
    %4 = arith.mulf %3, %2 : vector<2x256xf32>
    %c254_i32 = arith.constant 254 : i32
    %5 = tpu.dynamic_rotate %2 by %c254_i32 dim 1 : vector<2x256xf32>, i32 -> vector<2x256xf32>
    %cst_3 = arith.constant 1.000000e+01 : f32
    %6 = vector.broadcast %cst_3 : f32 to vector<2x256xf32>
    %7 = arith.mulf %6, %5 : vector<2x256xf32>
    %8 = arith.addf %4, %7 : vector<2x256xf32>
    %9 = vector.extract_strided_slice %8 {offsets = [0, 0], sizes = [2, 128], strides = [1, 1]} : vector<2x256xf32> to vector<2x128xf32>
    %c0_4 = arith.constant 0 : index
    %c0_5 = arith.constant 0 : index
    %10 = vector.load %arg4[%c0_4, %c0_5] : memref<2x128xf32, #tpu.memory_space<vmem>>, vector<2x128xf32>
    tpu.vector_store %arg4[%c0_4, %c0_5], %9 {strides = array<i32>} : memref<2x128xf32, #tpu.memory_space<vmem>>, vector<2x128xf32>,
    return
  }
  func.func @transform_0(%arg0: i32, %arg1: i32) -> (i32, i32) {
    %c0_i32 = arith.constant 0 : i32
    return %arg0, %arg1 : i32, i32
  }
  func.func @transform_1(%arg0: i32, %arg1: i32) -> (i32, i32) {
    %c1_i32 = arith.constant 1 : i32
    %0 = arith.addi %arg1, %c1_i32 : i32
    %c1_i32_0 = arith.constant 1 : i32
    %1 = arith.muli %0, %c1_i32_0 : i32
    %c0_i32 = arith.constant 0 : i32
    %2 = arith.minsi %1, %c0_i32 : i32
    %c0_i32_1 = arith.constant 0 : i32
    return %arg0, %2 : i32, i32
  }
  func.func @transform_2(%arg0: i32, %arg1: i32) -> (i32, i32) {
    %c0_i32 = arith.constant 0 : i32
    return %arg0, %arg1 : i32, i32
  }
}

</mosaic_0001>

<bundles_post_ra>
// kernel: tpu_custom_call.1
= control target key start
LH: loop header
LB: loop body
LE: loop exit
PB: predicated region body
PF: predicated region fallthrough
CT: control target
= control target key end

     0   :  { %7 = vsyncpa [#allocation3], 0  ;;  %s192_s0 = inlined_call_operand.hbm [shape: f32[2,128], index: 0, kind: input, shape index: {}]   ;;  %s193_s1 = inlined_call_operand.hbm [shape: f32[2,128], index: 1, kind: input, shape index: {}]   ;;  %s194_s2 = inlined_call_operand.hbm [shape: f32[2,126], index: 2, kind: output, shape index: {}]  }
   0x1   :  { %8 = vsyncpa [#allocation6], 0 }
   0x2   :  { %9 = vsyncpa [#allocation4], 0  ;;  %s15_s11 = sshll.u32 %s192_s0, 4  ;;  %s164_s12 = smov [#allocation2]   ;;  %s16_s11 = int_to_ptr.hbm [resolvable:$true] %s15_s11 }
   0x3   :  { %s17_s13 = sshll.u32 %s164_s12, 4  ;;  %s31_s16 = sshll.u32 %s193_s1, 4  ;;  %s18_s13 = int_to_ptr.vmem [resolvable:$true] %s17_s13  ;;  %s32_s16 = int_to_ptr.hbm [resolvable:$true] %s31_s16 }
   0x4   :  { %20 = dma.hbm_to_vmem [thread:$0]  %s16_s11, 32, %s18_s13, [#allocation3]  }
   0x5   :  { %s165_s17 = smov [#allocation5]  }
   0x6   :  { %s33_s18 = sshll.u32 %s165_s17, 4  ;;  %s34_s18 = int_to_ptr.vmem [resolvable:$true] %s33_s18 }
   0x7   :  { %36 = dma.hbm_to_vmem [thread:$0]  %s32_s16, 32, %s34_s18, [#allocation6]  }
   0x8   :  { %158 = dma.done.wait [#allocation3], 32  }
   0x9   :  { %159 = vsyncadd [#allocation3], 4294967264 }
   0xa   :  { %160 = dma.done.wait [#allocation6], 32  }
   0xb   :  { %161 = vsyncadd [#allocation6], 4294967264  ;;  %v48_v0 = vld [vmem:[#allocation2] sm:$0x3]  ;;  %s166_s0 = smov 126   ;;  %v55_v2 = vlaneseq  ;;  %s167_s1 = smov [#allocation7]  }
   0xc   :  { %51 = vrot.lane.b32.xlu0 %v48_v0, %s166_s0  ;;  %v49_v1 = vld [vmem:[#allocation5] sm:$0x3]  ;;  %v50_v5 = vmul.f32 -10.0, %v48_v0  ;;  %s67_s19 = sshll.u32 %s167_s1, 4  ;;  %s69_s22 = sshll.u32 %s194_s2, 4  ;;  %s68_s19 = int_to_ptr.vmem [resolvable:$true] %s67_s19  ;;  %s70_s22 = int_to_ptr.hbm [resolvable:$true] %s69_s22 }
   0xd   :  { %v56_v4 = vand.u32 127, %v55_v2 }
   0xf   :  { %vm57_vm0 = vcmp.lt.s32.totalorder %v56_v4, 126 }
  0x14   :  { %53 = vrot.lane.b32.xlu0 %v49_v1, %s166_s0 }
  0x7e   :  { %v52_v3 = vpop.permute.xlu0 %51 }
  0x86   :  { %v54_v6 = vpop.permute.xlu0 %53 }
  0x87   :  { %v58_v7 = vsel %vm57_vm0, %v52_v3, %v54_v6 }
  0x88   :  { %v59_v8 = vmul.f32 10.0, %v58_v7 }
  0x8a   :  { %v60_v9 = vadd.f32 %v59_v8, %v50_v5 }
  0x8c   :  { %61 = vst [vmem:[#allocation7] sm:$0x3] %v60_v9 }
  0x8d   :  { %72 = dma.vmem_to_hbm [thread:$0]  %s68_s19, 32, %s70_s22, [#allocation4]  }
  0x8e   :  { %162 = dma.done.wait [#allocation4], 32  }
  0x8f   :  { %163 = vsyncadd [#allocation4], 4294967264 }
  0x90   :  { %77 = vsyncpa [#allocation3], 1 }
  0x91   :  { %78 = vsyncpa [#allocation6], 1 }
  0x92   :  { %79 = vsyncpa [#allocation4], 1 }

</bundles_post_ra>
